<compile_context>
chip_gen: v6e
topology: v6e:2x2x1
jax: 0.10.0
libtpu: 0.0.40
codegen_flags: <defaults>
</compile_context>

<pallas_src>
import jax
import jax.numpy as jnp
from jax import lax
from jax.experimental import pallas as pl
from jax.experimental.pallas import tpu as pltpu


def _round_up(x, m):
    return ((x + m - 1) // m) * m


def _pick_tiling(B, H, W):
    """Choose pixel-tile width TN, padded pixel count Np, batch block Bt, padded batch Bp, VMEM limit."""
    N = H * W
    Hp, Wp = H + 2, W + 2
    kind = ""
    try:
        kind = jax.devices()[0].device_kind.lower()
    except Exception:  # pragma: no cover - robust if device query fails (AOT etc.)
        pass
    is_v7 = "v7" in kind
    if is_v7:
        # v7x: 64 MiB VMEM per TensorCore.
        cap, vmem_limit, budget = 4096, 56 * 1024 * 1024, 28 * 1024 * 1024
    elif ("v5" in kind) or ("v6" in kind):
        # v5e / v6e: 128 MiB VMEM.
        cap, vmem_limit, budget = 8192, 100 * 1024 * 1024, 56 * 1024 * 1024
    else:
        # Unknown generation: conservative.
        cap, vmem_limit, budget = 4096, 48 * 1024 * 1024, 24 * 1024 * 1024

    # VMEM budget model for per-tile intermediates: ~k live (dim, TN) f32 slabs
    # (tent C, matmul result T, tent R, product; x2 slack for unroll / pipelining),
    # after reserving the double-buffered resident image block.
    img_bytes = 2 * Hp * Wp * 4
    avail = max(budget - img_bytes, 2 * 1024 * 1024)
    k_slabs = 8
    tn_budget = avail // (k_slabs * (Hp + Wp) * 4)
    TN = max(128, min(cap, (tn_budget // 128) * 128, _round_up(N, 128)))
    Np = _round_up(N, TN)

    if Np == TN:
        # Tiny image: whole pixel axis fits one tile -> pack batch elements per grid step
        # to amortize ~0.35 us/step overhead. Pad B up to a multiple of Bt if needed.
        Bt = min(8, B)
        if is_v7 and B > 1:
            # Keep >= 2 grid steps so both v7x TensorCores get work.
            Bt = min(Bt, -(-B // 2))
    else:
        Bt = 1
    Bp = _round_up(B, Bt)
    return TN, Np, Bt, Bp, vmem_limit


def _make_kernel(M, K, Bt):
    """Kernel over an image block of shape (Bt, M, K).

    K (block's last axis) is the MXU-contracted axis (the LARGER padded image dim);
    M is the VPU/XLU-reduced axis (the smaller padded dim).
    """

    def kernel(im_ref, dxy_ref, o_ref):
        # im_ref : (Bt, M, K)   zero-padded images, VMEM-resident across the pixel-tile axis
        # dxy_ref: (Bt, 2, TN)  absolute padded-frame coords; row 0 -> K axis, row 1 -> M axis
        # o_ref  : (Bt, 1, TN)  warped output for this pixel tile
        #
        # (dim, 1) float iotas; broadcasting against (1, TN) happens inside the subtraction,
        # so no (dim, TN) iota slabs are materialized.
        kf = lax.broadcasted_iota(jnp.int32, (K, 1), 0).astype(jnp.float32)
        mf = kf if M == K else lax.broadcasted_iota(jnp.int32, (M, 1), 0).astype(jnp.float32)

        def body(bi, carry):
            im = im_ref[bi]                       # (M, K)
            d = dxy_ref[bi]                       # (2, TN)
            c = d[0:1, :]                         # coord along the contracted (K) axis
            r = d[1:2, :]                         # coord along the reduced (M) axis

            # Separable bilinear tent weights (exactly reproduces torch's clamped gather).
            Ck = jnp.maximum(1.0 - jnp.abs(kf - c), 0.0)                      # (K, TN)
            # Contract the larger padded dim on the MXU; Ck's buffer dies right here.
            T = jnp.dot(im, Ck, preferred_element_type=jnp.float32)           # (M, TN)
            Rm = jnp.maximum(1.0 - jnp.abs(mf - r), 0.0)                      # (M, TN)
            # Smaller dim: VPU multiply + XLU cross-sublane reduce.
            o_ref[bi] = jnp.sum(Rm * T, axis=0, keepdims=True)                # (1, TN)
            return carry

        if Bt == 1:
            body(0, 0)
        else:
            # Partial unroll only: full unroll over Bt=8 keeps too many (dim, TN) slabs live
            # and spills past the 64-vreg file.
            lax.fori_loop(0, Bt, body, 0, unroll=2)

    return kernel


def spatial_transformation(moving_image, deformation_matrix):
    """JAX/Pallas equivalent of SpatialTransformation.forward.

    moving_image:       (B, H, W, 1)  float
    deformation_matrix: (B, H, W, 2)  float, last axis = [dx, dy]
    returns:            (B, 1, H, W)  float32 (NCHW, channels=1)
    """
    B, H, W, C = moving_image.shape
    assert C == 1, "reference module samples a single-channel image"
    Hp, Wp = H + 2, W + 2
    N = H * W
    TN, Np, Bt, Bp, vmem_limit = _pick_tiling(B, H, W)

    # F.pad(im, (0,0,1,1,1,1,0,0)) -> zero-padded image.
    im_pad = jnp.pad(moving_image[..., 0].astype(jnp.float32), ((0, 0), (1, 1), (1, 1)))

    # Fold the pixel mesh into the deformation on the host (one fused elementwise XLA pass):
    # absolute sample coordinates in the padded frame (+1 for the 1-pixel zero pad).
    xm = jnp.arange(W, dtype=jnp.float32)[None, None, :]
    ym = jnp.arange(H, dtype=jnp.float32)[None, :, None]
    x_abs = deformation_matrix[..., 0].astype(jnp.float32) + xm + 1.0   # column coordinate
    y_abs = deformation_matrix[..., 1].astype(jnp.float32) + ym + 1.0   # row coordinate

    # Always contract the LARGER padded dim on the MXU: if Hp > Wp present the transposed image
    # to the kernel and swap which coordinate drives the contracted-axis tent.
    if Wp >= Hp:
        im_blk = im_pad                                   # (B, Hp, Wp): contract Wp
        M, K = Hp, Wp
        dxy = jnp.stack([x_abs.reshape(B, N), y_abs.reshape(B, N)], axis=1)   # (B, 2, N)
    else:
        im_blk = jnp.swapaxes(im_pad, 1, 2)               # (B, Wp, Hp): contract Hp
        M, K = Wp, Hp
        dxy = jnp.stack([y_abs.reshape(B, N), x_abs.reshape(B, N)], axis=1)   # (B, 2, N)

    if Np != N:
        dxy = jnp.pad(dxy, ((0, 0), (0, 0), (0, Np - N)))
    if Bp != B:
        im_blk = jnp.pad(im_blk, ((0, Bp - B), (0, 0), (0, 0)))
        dxy = jnp.pad(dxy, ((0, Bp - B), (0, 0), (0, 0)))

    kernel = _make_kernel(M, K, Bt)
    grid = (Bp // Bt, Np // TN)

    out_flat = pl.pallas_call(
        kernel,
        out_shape=jax.ShapeDtypeStruct((Bp, 1, Np), jnp.float32),
        grid_spec=pltpu.PrefetchScalarGridSpec(
            num_scalar_prefetch=0,
            grid=grid,
            in_specs=[
                # Padded image: index_map independent of the tile axis -> stays resident in VMEM
                # across all inner-axis steps (no re-DMA per tile).
                pl.BlockSpec((Bt, M, K), lambda b, t: (b, 0, 0)),
                # Packed absolute [c; r] coordinates: one DMA per step.
                pl.BlockSpec((Bt, 2, TN), lambda b, t: (b, 0, t)),
            ],
            out_specs=pl.BlockSpec((Bt, 1, TN), lambda b, t: (b, 0, t)),
        ),
        compiler_params=pltpu.CompilerParams(
            dimension_semantics=("parallel", "parallel"),
            vmem_limit_bytes=vmem_limit,
        ),
    )(im_blk, dxy)

    # (Bp, 1, Np) -> (B, 1, H, W)  (drop batch / pixel padding; NCHW like torch permute(0,3,1,2))
    return out_flat[:B, 0, :N].reshape(B, H, W)[:, None, :, :]


def _reference(moving_image, deformation_matrix):
    """Pure-JAX re-implementation of the PyTorch forward (clamped flat gather) for verification."""
    B, H, W, _ = moving_image.shape
    Hp, Wp = H + 2, W + 2
    im = jnp.pad(moving_image[..., 0].astype(jnp.float32), ((0, 0), (1, 1), (1, 1)))
    xm = jnp.arange(W, dtype=jnp.float32)[None, None, :]
    ym = jnp.arange(H, dtype=jnp.float32)[None, :, None]
    x = (deformation_matrix[..., 0].astype(jnp.float32) + xm).reshape(B, -1) + 1.0
    y = (deformation_matrix[..., 1].astype(jnp.float32) + ym).reshape(B, -1) + 1.0
    x0 = jnp.floor(x).astype(jnp.int32)
    x1 = x0 + 1
    y0 = jnp.floor(y).astype(jnp.int32)
    y1 = y0 + 1
    x0 = jnp.clip(x0, 0, Wp - 1)
    x1 = jnp.clip(x1, 0, Wp - 1)
    y0 = jnp.clip(y0, 0, Hp - 1)
    y1 = jnp.clip(y1, 0, Hp - 1)
    flat = im.reshape(B, -1)

    def g(yy, xx):
        return jnp.take_along_axis(flat, yy * Wp + xx, axis=1)

    Ia, Ib, Ic, Id = g(y0, x0), g(y1, x0), g(y0, x1), g(y1, x1)
    dxw = x1.astype(jnp.float32) - x
    dyw = y1.astype(jnp.float32) - y
    out = dxw * dyw * Ia + dxw * (1 - dyw) * Ib + (1 - dxw) * dyw * Ic + (1 - dxw) * (1 - dyw) * Id
    return out.reshape(B, H, W)[:, None, :, :]


if __name__ == "__main__":
    key = jax.random.PRNGKey(0)

    # Case 1: square image (column-contraction path).
    # Case 2: tall image H > W (transposed / row-contraction path).
    for (B, H, W) in [(2, 16, 16), (2, 24, 16)]:
        key, k_img, k_def = jax.random.split(key, 3)
        moving_image = jax.random.uniform(k_img, (B, H, W, 1), dtype=jnp.float32)
        # Deformations large enough to exercise out-of-bounds clamping at the padded border.
        deformation_matrix = 3.0 * jax.random.normal(k_def, (B, H, W, 2), dtype=jnp.float32)

        out = spatial_transformation(moving_image, deformation_matrix)
        out = jax.block_until_ready(out)
        assert out.shape == (B, 1, H, W), out.shape

        ref = jax.block_until_ready(_reference(moving_image, deformation_matrix))
        assert jnp.allclose(out, ref, atol=1e-4, rtol=1e-4), float(jnp.max(jnp.abs(out - ref)))

    print("KERNEL_OK")
</pallas_src>

<mosaic_0001>
module attributes {stable_mosaic.version = 11 : i64} {
  func.func @kernel(%arg0: i32, %arg1: i32, %arg2: memref<2x18x18xf32, #tpu.memory_space<vmem>>, %arg3: memref<2x2x256xf32, #tpu.memory_space<vmem>>, %arg4: memref<2x1x256xf32, #tpu.memory_space<vmem>>) attributes {dimension_semantics = [#tpu.dimension_semantics<parallel>, #tpu.dimension_semantics<parallel>], iteration_bounds = array<i64: 1, 1>, scalar_prefetch = 0 : i64, scratch_operands = 0 : i64, tpu.core_type = #tpu.core_type<tc>, window_params = [{transform_indices = @transform_0, window_bounds = array<i64: 2, 18, 18>}, {transform_indices = @transform_1, window_bounds = array<i64: 2, 2, 256>}, {transform_indices = @transform_2, window_bounds = array<i64: 2, 1, 256>}]} {
    %0 = tpu.iota {dimensions = array<i32: 0>} : vector<18x1xi32>
    %1 = arith.sitofp %0 : vector<18x1xi32> to vector<18x1xf32>
    %c0_i32 = arith.constant 0 : i32
    %2 = arith.index_cast %c0_i32 : i32 to index
    %c0 = arith.constant 0 : index
    %c0_0 = arith.constant 0 : index
    %3 = vector.load %arg2[%2, %c0, %c0_0] : memref<2x18x18xf32, #tpu.memory_space<vmem>>, vector<1x18x18xf32>
    %4 = vector.shape_cast %3 : vector<1x18x18xf32> to vector<18x18xf32>
    %5 = arith.index_cast %c0_i32 : i32 to index
    %c0_1 = arith.constant 0 : index
    %c0_2 = arith.constant 0 : index
    %6 = vector.load %arg3[%5, %c0_1, %c0_2] : memref<2x2x256xf32, #tpu.memory_space<vmem>>, vector<1x2x256xf32>
    %7 = vector.shape_cast %6 : vector<1x2x256xf32> to vector<2x256xf32>
    %8 = vector.extract_strided_slice %7 {offsets = [0, 0], sizes = [1, 256], strides = [1, 1]} : vector<2x256xf32> to vector<1x256xf32>
    %9 = vector.extract_strided_slice %7 {offsets = [1, 0], sizes = [1, 256], strides = [1, 1]} : vector<2x256xf32> to vector<1x256xf32>
    %10 = vector.broadcast %1 : vector<18x1xf32> to vector<18x256xf32>
    %11 = vector.broadcast %8 : vector<1x256xf32> to vector<18x256xf32>
    %12 = arith.subf %10, %11 : vector<18x256xf32>
    %13 = math.absf %12 : vector<18x256xf32>
    %cst = arith.constant 1.000000e+00 : f32
    %14 = vector.broadcast %cst : f32 to vector<18x256xf32>
    %15 = arith.subf %14, %13 : vector<18x256xf32>
    %cst_3 = arith.constant 0.000000e+00 : f32
    %16 = vector.broadcast %cst_3 : f32 to vector<18x256xf32>
    %17 = arith.maximumf %15, %16 : vector<18x256xf32>
    %cst_4 = arith.constant dense<0.000000e+00> : vector<18x256xf32>
    %18 = tpu.matmul %4, %17, %cst_4 {dimension_numbers = #tpu.dot_dimension_numbers<[1], [0], [0], [1], [0, 0, 1, 1], [], []>} : vector<18x18xf32>, vector<18x256xf32>, vector<18x256xf32> -> vector<18x256xf32>
    %19 = vector.broadcast %1 : vector<18x1xf32> to vector<18x256xf32>
    %20 = vector.broadcast %9 : vector<1x256xf32> to vector<18x256xf32>
    %21 = arith.subf %19, %20 : vector<18x256xf32>
    %22 = math.absf %21 : vector<18x256xf32>
    %cst_5 = arith.constant 1.000000e+00 : f32
    %23 = vector.broadcast %cst_5 : f32 to vector<18x256xf32>
    %24 = arith.subf %23, %22 : vector<18x256xf32>
    %cst_6 = arith.constant 0.000000e+00 : f32
    %25 = vector.broadcast %cst_6 : f32 to vector<18x256xf32>
    %26 = arith.maximumf %24, %25 : vector<18x256xf32>
    %27 = arith.mulf %26, %18 : vector<18x256xf32>
    %cst_7 = arith.constant dense<0.000000e+00> : vector<256xf32>
    %28 = vector.multi_reduction <add>, %27, %cst_7 [0] : vector<18x256xf32> to vector<256xf32>
    %29 = vector.shape_cast %28 : vector<256xf32> to vector<1x256xf32>
    %30 = arith.index_cast %c0_i32 : i32 to index
    %c0_8 = arith.constant 0 : index
    %c0_9 = arith.constant 0 : index
    %31 = vector.load %arg4[%30, %c0_8, %c0_9] : memref<2x1x256xf32, #tpu.memory_space<vmem>>, vector<1x1x256xf32>
    %32 = vector.shape_cast %31 : vector<1x1x256xf32> to vector<1x256xf32>
    %33 = vector.shape_cast %29 : vector<1x256xf32> to vector<1x1x256xf32>
    tpu.vector_store %arg4[%30, %c0_8, %c0_9], %33 {strides = array<i32>} : memref<2x1x256xf32, #tpu.memory_space<vmem>>, vector<1x1x256xf32>,
    %c1_i32 = arith.constant 1 : i32
    %34 = arith.index_cast %c1_i32 : i32 to index
    %c0_10 = arith.constant 0 : index
    %c0_11 = arith.constant 0 : index
    %35 = vector.load %arg2[%34, %c0_10, %c0_11] : memref<2x18x18xf32, #tpu.memory_space<vmem>>, vector<1x18x18xf32>
    %36 = vector.shape_cast %35 : vector<1x18x18xf32> to vector<18x18xf32>
    %37 = arith.index_cast %c1_i32 : i32 to index
    %c0_12 = arith.constant 0 : index
    %c0_13 = arith.constant 0 : index
    %38 = vector.load %arg3[%37, %c0_12, %c0_13] : memref<2x2x256xf32, #tpu.memory_space<vmem>>, vector<1x2x256xf32>
    %39 = vector.shape_cast %38 : vector<1x2x256xf32> to vector<2x256xf32>
    %40 = vector.extract_strided_slice %39 {offsets = [0, 0], sizes = [1, 256], strides = [1, 1]} : vector<2x256xf32> to vector<1x256xf32>
    %41 = vector.extract_strided_slice %39 {offsets = [1, 0], sizes = [1, 256], strides = [1, 1]} : vector<2x256xf32> to vector<1x256xf32>
    %42 = vector.broadcast %1 : vector<18x1xf32> to vector<18x256xf32>
    %43 = vector.broadcast %40 : vector<1x256xf32> to vector<18x256xf32>
    %44 = arith.subf %42, %43 : vector<18x256xf32>
    %45 = math.absf %44 : vector<18x256xf32>
    %cst_14 = arith.constant 1.000000e+00 : f32
    %46 = vector.broadcast %cst_14 : f32 to vector<18x256xf32>
    %47 = arith.subf %46, %45 : vector<18x256xf32>
    %cst_15 = arith.constant 0.000000e+00 : f32
    %48 = vector.broadcast %cst_15 : f32 to vector<18x256xf32>
    %49 = arith.maximumf %47, %48 : vector<18x256xf32>
    %cst_16 = arith.constant dense<0.000000e+00> : vector<18x256xf32>
    %50 = tpu.matmul %36, %49, %cst_16 {dimension_numbers = #tpu.dot_dimension_numbers<[1], [0], [0], [1], [0, 0, 1, 1], [], []>} : vector<18x18xf32>, vector<18x256xf32>, vector<18x256xf32> -> vector<18x256xf32>
    %51 = vector.broadcast %1 : vector<18x1xf32> to vector<18x256xf32>
    %52 = vector.broadcast %41 : vector<1x256xf32> to vector<18x256xf32>
    %53 = arith.subf %51, %52 : vector<18x256xf32>
    %54 = math.absf %53 : vector<18x256xf32>
    %cst_17 = arith.constant 1.000000e+00 : f32
    %55 = vector.broadcast %cst_17 : f32 to vector<18x256xf32>
    %56 = arith.subf %55, %54 : vector<18x256xf32>
    %cst_18 = arith.constant 0.000000e+00 : f32
    %57 = vector.broadcast %cst_18 : f32 to vector<18x256xf32>
    %58 = arith.maximumf %56, %57 : vector<18x256xf32>
    %59 = arith.mulf %58, %50 : vector<18x256xf32>
    %cst_19 = arith.constant dense<0.000000e+00> : vector<256xf32>
    %60 = vector.multi_reduction <add>, %59, %cst_19 [0] : vector<18x256xf32> to vector<256xf32>
    %61 = vector.shape_cast %60 : vector<256xf32> to vector<1x256xf32>
    %62 = arith.index_cast %c1_i32 : i32 to index
    %c0_20 = arith.constant 0 : index
    %c0_21 = arith.constant 0 : index
    %63 = vector.load %arg4[%62, %c0_20, %c0_21] : memref<2x1x256xf32, #tpu.memory_space<vmem>>, vector<1x1x256xf32>
    %64 = vector.shape_cast %63 : vector<1x1x256xf32> to vector<1x256xf32>
    %65 = vector.shape_cast %61 : vector<1x256xf32> to vector<1x1x256xf32>
    tpu.vector_store %arg4[%62, %c0_20, %c0_21], %65 {strides = array<i32>} : memref<2x1x256xf32, #tpu.memory_space<vmem>>, vector<1x1x256xf32>,
    %c2_i32 = arith.constant 2 : i32
    return
  }
  func.func @transform_0(%arg0: i32, %arg1: i32) -> (i32, i32, i32) {
    %c0_i32 = arith.constant 0 : i32
    %c0_i32_0 = arith.constant 0 : i32
    %c0_i32_1 = arith.constant 0 : i32
    return %arg0, %c0_i32, %c0_i32_0 : i32, i32, i32
  }
  func.func @transform_1(%arg0: i32, %arg1: i32) -> (i32, i32, i32) {
    %c0_i32 = arith.constant 0 : i32
    %c0_i32_0 = arith.constant 0 : i32
    return %arg0, %c0_i32, %arg1 : i32, i32, i32
  }
  func.func @transform_2(%arg0: i32, %arg1: i32) -> (i32, i32, i32) {
    %c0_i32 = arith.constant 0 : i32
    %c0_i32_0 = arith.constant 0 : i32
    return %arg0, %c0_i32, %arg1 : i32, i32, i32
  }
}

</mosaic_0001>

<bundles_post_ra>
// kernel: tpu_custom_call.1
= control target key start
LH: loop header
LB: loop body
LE: loop exit
PB: predicated region body
PF: predicated region fallthrough
CT: control target
= control target key end

     0   :  { %v12_v0 = vlaneseq  ;;  %v545_v1 = vmov 0.0   ;;  %s666_s0 = inlined_call_operand.vmem [shape: f32[2,18,18], index: 0, kind: input, shape index: {}]   ;;  %s667_s1 = inlined_call_operand.vmem [shape: f32[2,2,256], index: 1, kind: input, shape index: {}]   ;;  %s668_s2 = inlined_call_operand.hbm [shape: f32[2,1,256], index: 2, kind: output, shape index: {}]  }
   0x1   :  { %147 = vmatprep.mubr.f32.mxu0 %v545_v1  ;;  %383 = vmatprep.mubr.f32.mxu1 %v545_v1  ;;  %v573_v3 = vld [vmem:[%s667_s1] sm:$0xf]  ;;  %v578_v4 = vld [vmem:[%s667_s1 + $0x4] sm:$0xf] }
   0x2   :  { %v568_v2 = vshrl.u32 %v12_v0, 7 }
   0x3   :  { %7 = vsyncpa [#allocation3], 0  ;;  %vm76_vm0 = vcmask 1041408   ;;  %vm66_vm1 = vcmask 146432   ;;  %vm252_vm2 = vcmp.lt.s32.totalorder %v12_v0, 256 }
   0x4   :  { %v15_v5 = vadd.s32 16, %v568_v2  ;;  %v26_v6 = vsub.s32 0, %v568_v2  ;;  %v30_v7 = vsub.s32 2, %v568_v2  ;;  %v14_v8 = vadd.s32 8, %v568_v2 }
   0x5   :  { %v593_v18 = vcvt.s32.f32 %v568_v2 }
   0x6   :  { %v584_v9 = vcvt.s32.f32 %v15_v5  ;;  %v31_v10 = vrot.slane %v573_v3, %v30_v7  ;;  %v269_v11 = vrot.slane %v578_v4, %v30_v7  ;;  %v27_v12 = vrot.slane %v573_v3, %v26_v6 }
   0x7   :  { %v265_v13 = vrot.slane %v578_v4, %v26_v6  ;;  %v590_v14 = vcvt.s32.f32 %v14_v8  ;;  %v19_v8 = vld [vmem:[%s666_s0] sm:$0xff] }
   0x8   :  { %v41_v15 = vrot.slane %v31_v10, %v26_v6  ;;  %v279_v16 = vrot.slane %v269_v11, %v26_v6  ;;  %v37_v17 = vrot.slane %v27_v12, %v26_v6  ;;  %v509_v11 = vld [vmem:[%s666_s0 + $0x18] sm:$0xff]  ;;  %v20_v12 = vld [vmem:[%s666_s0 + $0x8] sm:$0xff] }
   0x9   :  { %v275_v19 = vrot.slane %v265_v13, %v26_v6  ;;  %v510_v13 = vld [vmem:[%s666_s0 + $0x20] sm:$0xff] }
   0xa   :  { %v47_v20 = vsub.f32 %v584_v9, %v41_v15  ;;  %v285_v21 = vsub.f32 %v584_v9, %v279_v16  ;;  %v46_v22 = vsub.f32 %v584_v9, %v37_v17  ;;  %v45_v23 = vsub.f32 %v590_v14, %v41_v15 }
   0xb   :  { %v284_v24 = vsub.f32 %v584_v9, %v275_v19  ;;  %v283_v25 = vsub.f32 %v590_v14, %v279_v16  ;;  %v44_v26 = vsub.f32 %v590_v14, %v37_v17  ;;  %v282_v27 = vsub.f32 %v590_v14, %v275_v19 }
   0xc   :  { %v53_v28 = vand.u32 2147483647, %v47_v20  ;;  %v291_v29 = vand.u32 2147483647, %v285_v21  ;;  %v52_v30 = vand.u32 2147483647, %v46_v22  ;;  %v43_v31 = vsub.f32 %v593_v18, %v41_v15 }
   0xd   :  { %v290_v32 = vand.u32 2147483647, %v284_v24  ;;  %v51_v33 = vand.u32 2147483647, %v45_v23  ;;  %v289_v34 = vand.u32 2147483647, %v283_v25  ;;  %v281_v35 = vsub.f32 %v593_v18, %v279_v16 }
   0xe   :  { %v59_v36 = vsub.f32 1.0, %v53_v28  ;;  %v297_v37 = vsub.f32 1.0, %v291_v29  ;;  %v58_v38 = vsub.f32 1.0, %v52_v30  ;;  %v50_v39 = vand.u32 2147483647, %v44_v26 }
   0xf   :  { %v296_v40 = vsub.f32 1.0, %v290_v32  ;;  %v57_v41 = vsub.f32 1.0, %v51_v33  ;;  %v295_v42 = vsub.f32 1.0, %v289_v34  ;;  %v288_v43 = vand.u32 2147483647, %v282_v27 }
  0x10   :  { %v65_v44 = vmax.f32 %v59_v36, 0.0  ;;  %v303_v45 = vmax.f32 %v297_v37, 0.0  ;;  %v64_v46 = vmax.f32 %v58_v38, 0.0  ;;  %v56_v47 = vsub.f32 1.0, %v50_v39  ;;  %v21_v15 = vld [vmem:[%s666_s0 + $0x10] sm:$0x3] }
  0x11   :  { %v302_v48 = vmax.f32 %v296_v40, 0.0  ;;  %v63_v49 = vmax.f32 %v57_v41, 0.0  ;;  %v301_v50 = vmax.f32 %v295_v42, 0.0  ;;  %v294_v51 = vsub.f32 1.0, %v288_v43  ;;  %v511_v16 = vld [vmem:[%s666_s0 + $0x28] sm:$0x3] }
  0x12   :  { %504 = vmatprep.subr.msk.mxu0 %vm76_vm0, %v65_v44  ;;  %513 = vmatprep.subr.msk.mxu1 %vm76_vm0, %v303_v45  ;;  %v62_v52 = vmax.f32 %v56_v47, 0.0  ;;  %v49_v53 = vand.u32 2147483647, %v43_v31  ;;  %v287_v54 = vand.u32 2147483647, %v281_v35  ;;  %v42_v55 = vsub.f32 %v593_v18, %v37_v17  ;;  %s547_s0 = smov [#allocation2]  }
  0x13   :  { %505 = vmatpush1.msk.msra.mxu0 %vm76_vm0, %v64_v46  ;;  %514 = vmatpush1.msk.msra.mxu1 %vm76_vm0, %v302_v48  ;;  %v300_v56 = vmax.f32 %v294_v51, 0.0  ;;  %v280_v57 = vsub.f32 %v593_v18, %v275_v19  ;;  %v168_v17 = vsub.s32 1, %v568_v2  ;;  %v172_v19 = vsub.s32 3, %v568_v2  ;;  %s493_s24 = sshll.u32 %s547_s0, 4  ;;  %s494_s24 = int_to_ptr.vmem [resolvable:$true] %s493_s24 }
  0x14   :  { %111 = vmatprep.subr.mxu0 %v63_v49  ;;  %347 = vmatprep.subr.mxu1 %v301_v50  ;;  %v55_v58 = vsub.f32 1.0, %v49_v53  ;;  %v293_v59 = vsub.f32 1.0, %v287_v54  ;;  %v48_v60 = vand.u32 2147483647, %v42_v55  ;;  %s523_s25 = scalar_lea.vmem %s494_s24, 64  ;;  %p528_p1 = scmp.lt.s32.totalorder %s494_s24, %s494_s24 }
  0x15   :  { %112 = vmatpush1.msra.mxu0 %v62_v52  ;;  %348 = vmatpush1.msra.mxu1 %v300_v56  ;;  %v286_v61 = vand.u32 2147483647, %v280_v57  ;;  %v169_v20 = vrot.slane %v573_v3, %v168_v17  ;;  %v405_v21 = vrot.slane %v578_v4, %v168_v17  ;;  %v173_v22 = vrot.slane %v573_v3, %v172_v19  ;;  %p524_p0 = scmp.ne.s32.totalorder %s494_s24, %s523_s25  ;;  %p529_p2 = scmp.lt.s32.totalorder %s523_s25, %s523_s25 }
  0x16   :  { %v61_v62 = vmax.f32 %v55_v58, 0.0  ;;  %v299_v63 = vmax.f32 %v293_v59, 0.0  ;;  %v54_v5 = vsub.f32 1.0, %v48_v60 }
  0x17   :  { %v292_v6 = vsub.f32 1.0, %v286_v61  ;;  %v179_v23 = vrot.slane %v169_v20, %v168_v17  ;;  %v415_v24 = vrot.slane %v405_v21, %v168_v17  ;;  %v183_v25 = vrot.slane %v173_v22, %v168_v17  ;;  %p530_p3 = por %p529_p2, %p528_p1 }
  0x18   :  { %113 = vmatprep.subr.mxu0 %v61_v62  ;;  %349 = vmatprep.subr.mxu1 %v299_v63  ;;  %v60_v7 = vmax.f32 %v54_v5, 0.0 }
  0x19   :  { %v298_v10 = vmax.f32 %v292_v6, 0.0  ;;  %v186_v26 = vsub.f32 %v590_v14, %v179_v23  ;;  %v422_v28 = vsub.f32 %v590_v14, %v415_v24  ;;  %v184_v29 = vsub.f32 %v593_v18, %v179_v23  ;;  %p531_p4 = pnand %p530_p3, %p524_p0 }
  0x1a   :  { %114 = vmatpush1.msra.mxu0 %v60_v7  ;;  %v187_v30 = vsub.f32 %v590_v14, %v183_v25  ;;  %v420_v31 = vsub.f32 %v593_v18, %v415_v24  ;;  %v188_v3 = vsub.f32 %v584_v9, %v179_v23  ;;  %v424_v34 = vsub.f32 %v584_v9, %v415_v24 }
  0x1b   :  { %350 = vmatpush1.msra.mxu1 %v298_v10  ;;  %506 = vmatmul.mubr.msk.f32.vlgmr.msra.gmra.mxu0 %vm66_vm1, %v19_v8  ;;  %v192_v33 = vand.u32 2147483647, %v186_v26  ;;  %v428_v36 = vand.u32 2147483647, %v422_v28  ;;  %v189_v37 = vsub.f32 %v584_v9, %v183_v25  ;;  %v190_v38 = vand.u32 2147483647, %v184_v29 }
  0x1c   :  { %515 = vmatmul.mubr.msk.f32.vlgmr.msra.gmra.mxu1 %vm66_vm1, %v509_v11  ;;  %153 = vmatprep.mubr.f32.mxu0 %v545_v1  ;;  %v193_v39 = vand.u32 2147483647, %v187_v30  ;;  %v426_v41 = vand.u32 2147483647, %v420_v31  ;;  %v194_v43 = vand.u32 2147483647, %v188_v3 }
  0x1d   :  { %389 = vmatprep.mubr.f32.mxu1 %v545_v1  ;;  %v198_v44 = vsub.f32 1.0, %v192_v33  ;;  %v430_v45 = vand.u32 2147483647, %v424_v34  ;;  %v434_v47 = vsub.f32 1.0, %v428_v36  ;;  %v195_v48 = vand.u32 2147483647, %v189_v37 }
  0x1e   :  { %v196_v50 = vsub.f32 1.0, %v190_v38  ;;  %v199_v51 = vsub.f32 1.0, %v193_v39  ;;  %v432_v53 = vsub.f32 1.0, %v426_v41  ;;  %v200_v55 = vsub.f32 1.0, %v194_v43 }
  0x1f   :  { %507 = vmatmul.mubr.msk.f32.gmra.mxu0 %vm66_vm1, %v20_v12  ;;  %v436_v58 = vsub.f32 1.0, %v430_v45  ;;  %v440_v61 = vmax.f32 %v434_v47, 0.0  ;;  %v201_v62 = vsub.f32 1.0, %v195_v48 }
  0x20   :  { %516 = vmatmul.mubr.msk.f32.gmra.mxu1 %vm66_vm1, %v510_v13  ;;  %159 = vmatprep.mubr.f32.mxu0 %v545_v1  ;;  %v202_v63 = vmax.f32 %v196_v50, 0.0  ;;  %v205_v6 = vmax.f32 %v199_v51, 0.0  ;;  %v438_v8 = vmax.f32 %v432_v53, 0.0  ;;  %v206_v12 = vmax.f32 %v200_v55, 0.0 }
  0x21   :  { %395 = vmatprep.mubr.f32.mxu1 %v545_v1  ;;  %v409_v1 = vrot.slane %v578_v4, %v172_v19  ;;  %v185_v4 = vsub.f32 %v593_v18, %v183_v25  ;;  %v207_v22 = vmax.f32 %v201_v62, 0.0  ;;  %v546_v53 = vmov 1966171168  }
  0x23   :  { %508 = vmatmul.mubr.msk.f32.gmra.mxu0 %vm66_vm1, %v21_v15  ;;  %v419_v27 = vrot.slane %v409_v1, %v168_v17  ;;  %v442_v17 = vmax.f32 %v436_v58, 0.0 }
  0x24   :  { %517 = vmatmul.mubr.msk.f32.gmra.mxu1 %vm66_vm1, %v511_v16 }
  0x25   :  { %v423_v32 = vsub.f32 %v590_v14, %v419_v27  ;;  %v421_v35 = vsub.f32 %v593_v18, %v419_v27  ;;  %v425_v40 = vsub.f32 %v584_v9, %v419_v27  ;;  %v191_v14 = vand.u32 2147483647, %v185_v4 }
  0x26   :  { %v204_v9 = vmax.f32 %v198_v44, 0.0 }
  0x27   :  { %v429_v42 = vand.u32 2147483647, %v423_v32  ;;  %v427_v46 = vand.u32 2147483647, %v421_v35  ;;  %v431_v18 = vand.u32 2147483647, %v425_v40 }
  0x28   :  { %v197_v57 = vsub.f32 1.0, %v191_v14 }
  0x29   :  { %v435_v54 = vsub.f32 1.0, %v429_v42  ;;  %v433_v60 = vsub.f32 1.0, %v427_v46  ;;  %v437_v7 = vsub.f32 1.0, %v431_v18 }
  0x2a   :  { %v203_v13 = vmax.f32 %v197_v57, 0.0 }
  0x2b   :  { %v441_v11 = vmax.f32 %v435_v54, 0.0  ;;  %v439_v19 = vmax.f32 %v433_v60, 0.0  ;;  %v443_v25 = vmax.f32 %v437_v7, 0.0  ;;  %v236_v54 = vunpack.c.l.s4 %v546_v53 }
  0x2d   :  { %v237_v62 = vunpack.c.0.s8 %v236_v54 }
  0xdb   :  { %v149_v49 = vpop.f32.mrf.mxu0 }
  0xdc   :  { %v385_v52 = vpop.f32.mrf.mxu1  ;;  %v208_v1 = vmul.f32 %v202_v63, %v149_v49 }
  0xdd   :  { %v151_v56 = vpop.f32.mrf.mxu0  ;;  %v444_v26 = vmul.f32 %v438_v8, %v385_v52 }
  0xde   :  { %v387_v59 = vpop.f32.mrf.mxu1  ;;  %v209_v30 = vmul.f32 %v203_v13, %v151_v56 }
  0xdf   :  { %v155_v5 = vpop.f32.mrf.mxu0  ;;  %v445_v4 = vmul.f32 %v439_v19, %v387_v59 }
  0xe0   :  { %v391_v10 = vpop.f32.mrf.mxu1  ;;  %v210_v15 = vmul.f32 %v204_v9, %v155_v5 }
  0xe1   :  { %v157_v16 = vpop.f32.mrf.mxu0  ;;  %v446_v20 = vmul.f32 %v440_v61, %v391_v10 }
  0xe2   :  { %v393_v21 = vpop.f32.mrf.mxu1  ;;  %v211_v23 = vmul.f32 %v205_v6, %v157_v16  ;;  %v214_v31 = vadd.f32 %v210_v15, %v208_v1 }
  0xe3   :  { %v161_v24 = vpop.f32.mrf.mxu0  ;;  %v447_v27 = vmul.f32 %v441_v11, %v393_v21  ;;  %v450_v33 = vadd.f32 %v446_v20, %v444_v26  ;;  %v240_v11 = vsub.s32 %v237_v62, %v568_v2 }
  0xe4   :  { %v212_v28 = vmul.f32 %v206_v12, %v161_v24  ;;  %v397_v29 = vpop.f32.mrf.mxu1  ;;  %v223_v37 = vadd.f32 %v211_v23, %v209_v30 }
  0xe5   :  { %v448_v32 = vmul.f32 %v442_v17, %v397_v29  ;;  %v163_v3 = vpop.f32.mrf.mxu0  ;;  %v459_v41 = vadd.f32 %v447_v27, %v445_v4 }
  0xe6   :  { %v215_v34 = vsel %vm76_vm0, %v212_v28, 0.0  ;;  %v213_v35 = vmul.f32 %v207_v22, %v163_v3  ;;  %v399_v36 = vpop.f32.mrf.mxu1 }
  0xe7   :  { %v216_v38 = vadd.f32 %v215_v34, %v214_v31  ;;  %v451_v39 = vsel %vm76_vm0, %v448_v32, 0.0  ;;  %v449_v40 = vmul.f32 %v443_v25, %v399_v36 }
  0xe8   :  { %v452_v42 = vadd.f32 %v451_v39, %v450_v33  ;;  %v224_v43 = vsel %vm76_vm0, %v213_v35, 0.0 }
  0xe9   :  { %v217_v14 = vrot.slane %v216_v38, 4  ;;  %v225_v44 = vadd.f32 %v224_v43, %v223_v37  ;;  %v460_v45 = vsel %vm76_vm0, %v449_v40, 0.0 }
  0xea   :  { %v453_v46 = vrot.slane %v452_v42, 4  ;;  %v461_v47 = vadd.f32 %v460_v45, %v459_v41 }
  0xeb   :  { %v218_v48 = vadd.f32 %v217_v14, %v216_v38  ;;  %v226_v49 = vrot.slane %v225_v44, 4 }
  0xec   :  { %v454_v50 = vadd.f32 %v453_v46, %v452_v42  ;;  %v462_v51 = vrot.slane %v461_v47, 4 }
  0xed   :  { %v219_v18 = vrot.slane %v218_v48, 2  ;;  %v227_v52 = vadd.f32 %v226_v49, %v225_v44 }
  0xee   :  { %v455_v55 = vrot.slane %v454_v50, 2  ;;  %v463_v56 = vadd.f32 %v462_v51, %v461_v47 }
  0xef   :  { %v220_v57 = vadd.f32 %v219_v18, %v218_v48  ;;  %v228_v9 = vrot.slane %v227_v52, 2 }
  0xf0   :  { %v456_v58 = vadd.f32 %v455_v55, %v454_v50  ;;  %v464_v59 = vrot.slane %v463_v56, 2 }
  0xf1   :  { %v221_v60 = vrot.slane %v220_v57, 1  ;;  %v229_v61 = vadd.f32 %v228_v9, %v227_v52 }
  0xf2   :  { %v457_v63 = vrot.slane %v456_v58, 1  ;;  %v465_v5 = vadd.f32 %v464_v59, %v463_v56 }
  0xf3   :  { %v230_v6 = vrot.slane %v229_v61, 1  ;;  %v222_v8 = vadd.f32 %v221_v60, %v220_v57 }
  0xf4   :  { %v466_v7 = vrot.slane %v465_v5, 1  ;;  %v458_v12 = vadd.f32 %v457_v63, %v456_v58 }
  0xf5   :  { %v231_v10 = vadd.f32 %v230_v6, %v229_v61 }
  0xf6   :  { %v467_v13 = vadd.f32 %v466_v7, %v465_v5 }
  0xf7   :  { %v234_v15 = vcombine.low %v222_v8, %v231_v10 }
  0xf8   :  { %v470_v16 = vcombine.low %v458_v12, %v467_v13 }
  0xf9   :  { %v241_v17 = vrot.slane %v234_v15, %v240_v11 }
  0xfa   :  { %v477_v19 = vrot.slane %v470_v16, %v240_v11 }
  0xfb   :  { %v248_v20 = vrot.slane %v241_v17, %v240_v11 }
  0xfc   :  { %v484_v21 = vrot.slane %v477_v19, %v240_v11 }
  0xfd   :  { %254 = vst.msk [vmem:[#allocation2] sm:$0x3] %vm252_vm2, %v248_v20 }
  0xfe   :  { %487 = vst.msk [vmem:[#allocation2 + $0x2] sm:$0x3] %vm252_vm2, %v484_v21 }
  0xff   :  { %534 = shalt.err (!%p531_p4)
}
 0x100   :  { %s548_s26 = smov 32   ;;  %s549_s27 = smov 2  }
 0x101   :  { %499 = dma.vmem_to_hbm [thread:$0]  %s494_s24, 64, %s668_s2, [#allocation3], %s548_s26, %s548_s26, %s549_s27  }
 0x102   :  { %543 = dma.done.wait [#allocation3], 64  }
 0x103   :  { %544 = vsyncadd [#allocation3], 4294967232 }
 0x104   :  { %503 = vsyncpa [#allocation3], 1 }

</bundles_post_ra>
